<compile_context>
chip_gen: v5e
topology: v5e:2x2
jax: 0.10.0
libtpu: 0.0.40
codegen_flags: <defaults>
</compile_context>

<pallas_src>
import math
import functools

import jax
import jax.numpy as jnp
from jax import lax
from jax.experimental import pallas as pl
from jax.experimental.pallas import tpu as pltpu

# --- module hyperparameters (from the PyTorch source) ---
BLOCK_SIZE = 8          # block_size
NB_EMBED = 32           # nb_embed
HEAD_SIZE = NB_EMBED    # head_size
VOCAB_SIZE = 65         # typical Shakespeare char vocab (deterministic, synthetic)
V_PAD = 128             # lane-dense padded logits dimension (multiple of 128)


def _attention_lm_kernel(x_ref, wqkv_ref, wlm_ref, blm_ref, o_ref, *, b_tile, seq_len):
    """One batch *tile* (b_tile batch elements) per grid step.

    x_ref    : (b_tile*T, C)    compute dtype (f32 or bf16)  VMEM  -- rows pre-flattened
    wqkv_ref : (C, 3H)          compute dtype; Q columns pre-scaled by C**-0.5
    wlm_ref  : (H, V_PAD)       compute dtype; zero-padded past VOCAB_SIZE
    blm_ref  : (1, V_PAD)       f32; zero-padded past VOCAB_SIZE
    o_ref    : (b_tile*T, V_PAD) f32
    """
    t = seq_len
    cd = x_ref.dtype
    h = wqkv_ref.shape[1] // 3

    # --- fused Q/K/V projection: one (b_tile*T, C) @ (C, 3H) MXU matmul, f32 accumulate ---
    qkv = jnp.dot(x_ref[...], wqkv_ref[...], preferred_element_type=jnp.float32)
    # f32 reshape, trailing dim unchanged, split aligned to the 8-row sublane tile.
    qkv = qkv.reshape(b_tile, t, 3 * h)
    q = qkv[:, :, 0:h].astype(cd)          # scale already folded into the weights
    k = qkv[:, :, h:2 * h].astype(cd)
    v = qkv[:, :, 2 * h:3 * h].astype(cd)

    # --- causal attention over the whole batch tile (batched einsum) ---
    wei = jnp.einsum("btd,bsd->bts", q, k, preferred_element_type=jnp.float32)

    row = lax.broadcasted_iota(jnp.int32, (t, t), 0)
    col = lax.broadcasted_iota(jnp.int32, (t, t), 1)
    bias = jnp.where(col <= row, 0.0, -1e30).astype(jnp.float32)   # finite -> NaN-safe
    wei = wei + bias[None, :, :]

    # softmax along last axis, kept in f32 (v5e has no bf16 VPU/EUP)
    m = jnp.max(wei, axis=-1, keepdims=True)
    e = jnp.exp(wei - m)
    s = jnp.sum(e, axis=-1, keepdims=True)
    p = e * pl.reciprocal(s, approx=True)          # divide on the EUP slot

    out = jnp.einsum("bts,bsd->btd", p.astype(cd), v, preferred_element_type=jnp.float32)
    out2d = out.reshape(b_tile * t, h).astype(cd)  # f32 merge aligned to sublane tile, then cast

    # --- LM head: one (b_tile*T, H) @ (H, 128) matmul -> lane-dense store ---
    logits = jnp.dot(out2d, wlm_ref[...], preferred_element_type=jnp.float32)
    o_ref[...] = logits + blm_ref[...]             # (1, V_PAD) broadcast, f32


def prepare_params(params, compute_dtype=jnp.float32):
    """One-time weight transform: fuse Q/K/V, fold the 1/sqrt(C) scale into Q,
    zero-pad the LM head to V_PAD lanes, and cast matmul operands to compute_dtype."""
    scale = jnp.float32(NB_EMBED) ** -0.5
    wqkv = jnp.concatenate(
        [params["wq"] * scale, params["wk"], params["wv"]], axis=1)        # (C, 3H)
    wlm_pad = jnp.zeros((HEAD_SIZE, V_PAD), jnp.float32).at[:, :VOCAB_SIZE].set(params["wlm"])
    blm_pad = jnp.zeros((1, V_PAD), jnp.float32).at[:, :VOCAB_SIZE].set(params["blm"])
    return {
        "token_embedding": params["token_embedding"],
        "position_embedding": params["position_embedding"],
        "wqkv": wqkv.astype(compute_dtype),
        "wlm": wlm_pad.astype(compute_dtype),
        "blm": blm_pad,                      # stays f32; added after f32 accumulation
    }


def single_head_attention_forward(idx, packed, *, b_tile=16):
    """Forward pass of SingleHeadAttention (targets=None path). Returns logits (B, T, V)."""
    B, T = idx.shape
    assert T <= BLOCK_SIZE
    C, H = NB_EMBED, HEAD_SIZE
    compute_dtype = packed["wqkv"].dtype

    # --- glue: embedding lookups in plain JAX ---
    tok = jnp.take(packed["token_embedding"], idx, axis=0)        # (B, T, C)
    pos = packed["position_embedding"][:T]                        # (T, C)
    x = (tok + pos[None, :, :]).astype(compute_dtype)             # (B, T, C)

    # pad batch to a multiple of the tile, flatten rows to (B_pad*T, C)
    n_tiles = pl.cdiv(B, b_tile)
    B_pad = n_tiles * b_tile
    if B_pad != B:
        x = jnp.pad(x, ((0, B_pad - B), (0, 0), (0, 0)))
    x2d = x.reshape(B_pad * T, C)

    kernel = pl.pallas_call(
        functools.partial(_attention_lm_kernel, b_tile=b_tile, seq_len=T),
        out_shape=jax.ShapeDtypeStruct((B_pad * T, V_PAD), jnp.float32),
        grid_spec=pltpu.PrefetchScalarGridSpec(
            num_scalar_prefetch=0,
            grid=(n_tiles,),
            in_specs=[
                pl.BlockSpec((b_tile * T, C), lambda i: (i, 0)),   # x rows (per-tile)
                pl.BlockSpec((C, 3 * H), lambda i: (0, 0)),        # fused wqkv
                pl.BlockSpec((H, V_PAD), lambda i: (0, 0)),        # padded lm weight
                pl.BlockSpec((1, V_PAD), lambda i: (0, 0)),        # padded lm bias
            ],
            out_specs=pl.BlockSpec((b_tile * T, V_PAD), lambda i: (i, 0)),
        ),
        compiler_params=pltpu.CompilerParams(
            dimension_semantics=("parallel",),   # >1 tile -> both TCs busy on v7x
        ),
    )

    logits_pad = kernel(x2d, packed["wqkv"], packed["wlm"], packed["blm"])
    # slice padded batch rows and padded vocab lanes back off
    return logits_pad.reshape(B_pad, T, V_PAD)[:B, :, :VOCAB_SIZE]


def init_params(key):
    """Deterministic synthetic parameter init (shapes match the PyTorch module)."""
    ks = jax.random.split(key, 6)
    scale_emb = 1.0
    scale_lin = 1.0 / math.sqrt(NB_EMBED)
    params = {
        "token_embedding": scale_emb * jax.random.normal(ks[0], (VOCAB_SIZE, NB_EMBED), jnp.float32),
        "position_embedding": scale_emb * jax.random.normal(ks[1], (BLOCK_SIZE, NB_EMBED), jnp.float32),
        # stored as (in, out) so kernel does x @ W  (== torch x @ W.T)
        "wq": scale_lin * jax.random.normal(ks[2], (NB_EMBED, HEAD_SIZE), jnp.float32),
        "wk": scale_lin * jax.random.normal(ks[3], (NB_EMBED, HEAD_SIZE), jnp.float32),
        "wv": scale_lin * jax.random.normal(ks[4], (NB_EMBED, HEAD_SIZE), jnp.float32),
        "wlm": scale_lin * jax.random.normal(ks[5], (HEAD_SIZE, VOCAB_SIZE), jnp.float32),
        "blm": jnp.zeros((1, VOCAB_SIZE), jnp.float32),
    }
    return params


def _reference_forward(idx, params):
    """Pure-JAX reference for a sanity check."""
    B, T = idx.shape
    tok = jnp.take(params["token_embedding"], idx, axis=0)
    pos = params["position_embedding"][:T]
    x = tok + pos[None, :, :]
    q = x @ params["wq"]
    k = x @ params["wk"]
    v = x @ params["wv"]
    wei = jnp.einsum("btd,bsd->bts", q, k) * (NB_EMBED ** -0.5)
    mask = jnp.tril(jnp.ones((T, T), bool))
    wei = jnp.where(mask[None], wei, -jnp.inf)
    wei = jax.nn.softmax(wei, axis=-1)
    out = jnp.einsum("bts,bsd->btd", wei, v)
    return out @ params["wlm"] + params["blm"][0]


if __name__ == "__main__":
    key = jax.random.PRNGKey(0)
    params = init_params(key)

    # batch sized so each grid step holds b_tile*T = 128 rows and there are 2 grid steps
    B, T = 32, BLOCK_SIZE
    idx = jax.random.randint(jax.random.PRNGKey(1), (B, T), 0, VOCAB_SIZE, dtype=jnp.int32)

    ref = _reference_forward(idx, params)

    # f32 path (tight correctness check; approx reciprocal accounts for the tolerance)
    packed_f32 = prepare_params(params, jnp.float32)
    logits = jax.block_until_ready(single_head_attention_forward(idx, packed_f32))
    assert logits.shape == (B, T, VOCAB_SIZE)
    assert jnp.allclose(logits, ref, atol=5e-3, rtol=5e-3)

    # bf16 matmul-operand path (v6e/v7x MXU-native; f32 accumulation, f32 softmax)
    packed_bf16 = prepare_params(params, jnp.bfloat16)
    logits_bf16 = jax.block_until_ready(single_head_attention_forward(idx, packed_bf16))
    assert logits_bf16.shape == (B, T, VOCAB_SIZE)
    assert jnp.allclose(logits_bf16, ref, atol=0.3, rtol=0.1)

    # TODO(synk): cross-entropy loss / generate() sampling paths are left in plain JAX land.
    print("KERNEL_OK")
</pallas_src>

<mosaic_0001>
module attributes {stable_mosaic.version = 11 : i64} {
  func.func @_attention_lm_kernel(%arg0: i32, %arg1: memref<128x32xf32, #tpu.memory_space<vmem>>, %arg2: memref<32x96xf32, #tpu.memory_space<vmem>>, %arg3: memref<32x128xf32, #tpu.memory_space<vmem>>, %arg4: memref<1x128xf32, #tpu.memory_space<vmem>>, %arg5: memref<128x128xf32, #tpu.memory_space<vmem>>) attributes {dimension_semantics = [#tpu.dimension_semantics<parallel>], iteration_bounds = array<i64: 2>, scalar_prefetch = 0 : i64, scratch_operands = 0 : i64, tpu.core_type = #tpu.core_type<tc>, window_params = [{transform_indices = @transform_0, window_bounds = array<i64: 128, 32>}, {pipeline_mode = #tpu.pipeline_mode<synchronous>, transform_indices = @transform_1, window_bounds = array<i64: 32, 96>}, {pipeline_mode = #tpu.pipeline_mode<synchronous>, transform_indices = @transform_2, window_bounds = array<i64: 32, 128>}, {pipeline_mode = #tpu.pipeline_mode<synchronous>, transform_indices = @transform_3, window_bounds = array<i64: 1, 128>}, {transform_indices = @transform_4, window_bounds = array<i64: 128, 128>}]} {
    %c0 = arith.constant 0 : index
    %c0_0 = arith.constant 0 : index
    %0 = vector.load %arg1[%c0, %c0_0] : memref<128x32xf32, #tpu.memory_space<vmem>>, vector<128x32xf32>
    %c0_1 = arith.constant 0 : index
    %c0_2 = arith.constant 0 : index
    %1 = vector.load %arg2[%c0_1, %c0_2] : memref<32x96xf32, #tpu.memory_space<vmem>>, vector<32x96xf32>
    %cst = arith.constant dense<0.000000e+00> : vector<128x96xf32>
    %2 = tpu.matmul %0, %1, %cst {dimension_numbers = #tpu.dot_dimension_numbers<[1], [0], [0], [1], [0, 0, 1, 1], [], []>} : vector<128x32xf32>, vector<32x96xf32>, vector<128x96xf32> -> vector<128x96xf32>
    %3 = vector.shape_cast %2 : vector<128x96xf32> to vector<16x8x96xf32>
    %4 = vector.extract_strided_slice %3 {offsets = [0, 0, 0], sizes = [16, 8, 32], strides = [1, 1, 1]} : vector<16x8x96xf32> to vector<16x8x32xf32>
    %5 = vector.extract_strided_slice %3 {offsets = [0, 0, 32], sizes = [16, 8, 32], strides = [1, 1, 1]} : vector<16x8x96xf32> to vector<16x8x32xf32>
    %6 = vector.extract_strided_slice %3 {offsets = [0, 0, 64], sizes = [16, 8, 32], strides = [1, 1, 1]} : vector<16x8x96xf32> to vector<16x8x32xf32>
    "tpu.trace_start"() <{level = 10 : i32, message = "btd,bsd->bts"}> : () -> ()
    %cst_3 = arith.constant dense<0.000000e+00> : vector<16x8x8xf32>
    %7 = tpu.matmul %4, %5, %cst_3 {dimension_numbers = #tpu.dot_dimension_numbers<[2], [2], [1], [1], [0, 0, 0, 1, 1, 1], [0], [0]>} : vector<16x8x32xf32>, vector<16x8x32xf32>, vector<16x8x8xf32> -> vector<16x8x8xf32>
    "tpu.trace_stop"() : () -> ()
    %8 = tpu.iota {dimensions = array<i32: 0>} : vector<8x8xi32>
    %9 = tpu.iota {dimensions = array<i32: 1>} : vector<8x8xi32>
    %10 = arith.cmpi sle, %9, %8 : vector<8x8xi32>
    %cst_4 = arith.constant 0.000000e+00 : f32
    %cst_5 = arith.constant -1.000000e+30 : f32
    %11 = vector.broadcast %cst_4 : f32 to vector<8x8xf32>
    %12 = vector.broadcast %cst_5 : f32 to vector<8x8xf32>
    %13 = arith.select %10, %11, %12 : vector<8x8xi1>, vector<8x8xf32>
    %14 = vector.shape_cast %13 : vector<8x8xf32> to vector<1x8x8xf32>
    %15 = vector.broadcast %14 : vector<1x8x8xf32> to vector<16x8x8xf32>
    %16 = arith.addf %7, %15 : vector<16x8x8xf32>
    %cst_6 = arith.constant dense<0xFF800000> : vector<16x8xf32>
    %17 = vector.multi_reduction <maximumf>, %16, %cst_6 [2] : vector<16x8x8xf32> to vector<16x8xf32>
    %18 = vector.shape_cast %17 : vector<16x8xf32> to vector<16x8x1xf32>
    %19 = vector.broadcast %18 : vector<16x8x1xf32> to vector<16x8x8xf32>
    %20 = arith.subf %16, %19 : vector<16x8x8xf32>
    %21 = math.exp %20 : vector<16x8x8xf32>
    %cst_7 = arith.constant dense<0.000000e+00> : vector<16x8xf32>
    %22 = vector.multi_reduction <add>, %21, %cst_7 [2] : vector<16x8x8xf32> to vector<16x8xf32>
    %23 = vector.shape_cast %22 : vector<16x8xf32> to vector<16x8x1xf32>
    %24 = tpu.reciprocal %23 {approx = true} : vector<16x8x1xf32> -> vector<16x8x1xf32>
    %25 = vector.broadcast %24 : vector<16x8x1xf32> to vector<16x8x8xf32>
    %26 = arith.mulf %21, %25 : vector<16x8x8xf32>
    "tpu.trace_start"() <{level = 10 : i32, message = "bts,bsd->btd"}> : () -> ()
    %cst_8 = arith.constant dense<0.000000e+00> : vector<16x8x32xf32>
    %27 = tpu.matmul %26, %6, %cst_8 {dimension_numbers = #tpu.dot_dimension_numbers<[2], [1], [1], [2], [0, 0, 0, 1, 1, 2], [0], [0]>} : vector<16x8x8xf32>, vector<16x8x32xf32>, vector<16x8x32xf32> -> vector<16x8x32xf32>
    "tpu.trace_stop"() : () -> ()
    %28 = vector.shape_cast %27 : vector<16x8x32xf32> to vector<128x32xf32>
    %c0_9 = arith.constant 0 : index
    %c0_10 = arith.constant 0 : index
    %29 = vector.load %arg3[%c0_9, %c0_10] : memref<32x128xf32, #tpu.memory_space<vmem>>, vector<32x128xf32>
    %cst_11 = arith.constant dense<0.000000e+00> : vector<128x128xf32>
    %30 = tpu.matmul %28, %29, %cst_11 {dimension_numbers = #tpu.dot_dimension_numbers<[1], [0], [0], [1], [0, 0, 1, 1], [], []>} : vector<128x32xf32>, vector<32x128xf32>, vector<128x128xf32> -> vector<128x128xf32>
    %c0_12 = arith.constant 0 : index
    %c0_13 = arith.constant 0 : index
    %31 = vector.load %arg4[%c0_12, %c0_13] : memref<1x128xf32, #tpu.memory_space<vmem>>, vector<1x128xf32>
    %32 = vector.broadcast %31 : vector<1x128xf32> to vector<128x128xf32>
    %33 = arith.addf %30, %32 : vector<128x128xf32>
    %c0_14 = arith.constant 0 : index
    %c0_15 = arith.constant 0 : index
    %34 = vector.load %arg5[%c0_14, %c0_15] : memref<128x128xf32, #tpu.memory_space<vmem>>, vector<128x128xf32>
    tpu.vector_store %arg5[%c0_14, %c0_15], %33 {strides = array<i32>} : memref<128x128xf32, #tpu.memory_space<vmem>>, vector<128x128xf32>,
    return
  }
  func.func @transform_0(%arg0: i32) -> (i32, i32) {
    %c0_i32 = arith.constant 0 : i32
    %c0_i32_0 = arith.constant 0 : i32
    return %arg0, %c0_i32 : i32, i32
  }
  func.func @transform_1(%arg0: i32) -> (i32, i32) {
    %c0_i32 = arith.constant 0 : i32
    %c0_i32_0 = arith.constant 0 : i32
    %c0_i32_1 = arith.constant 0 : i32
    return %c0_i32, %c0_i32_0 : i32, i32
  }
  func.func @transform_2(%arg0: i32) -> (i32, i32) {
    %c0_i32 = arith.constant 0 : i32
    %c0_i32_0 = arith.constant 0 : i32
    %c0_i32_1 = arith.constant 0 : i32
    return %c0_i32, %c0_i32_0 : i32, i32
  }
  func.func @transform_3(%arg0: i32) -> (i32, i32) {
    %c0_i32 = arith.constant 0 : i32
    %c0_i32_0 = arith.constant 0 : i32
    %c0_i32_1 = arith.constant 0 : i32
    return %c0_i32, %c0_i32_0 : i32, i32
  }
  func.func @transform_4(%arg0: i32) -> (i32, i32) {
    %c0_i32 = arith.constant 0 : i32
    %c0_i32_0 = arith.constant 0 : i32
    return %arg0, %c0_i32 : i32, i32
  }
}

</mosaic_0001>

<bundles_post_ra>
// kernel: tpu_custom_call.1
= control target key start
LH: loop header
LB: loop body
LE: loop exit
PB: predicated region body
PF: predicated region fallthrough
CT: control target
= control target key end

     0   :  { %9 = vsyncpa [#allocation3], 0  ;;  %s2409_s0 = inlined_call_operand.vmem [shape: f32[256,32], index: 0, kind: input, shape index: {}]   ;;  %s2410_s1 = inlined_call_operand.vmem [shape: f32[32,96], index: 1, kind: input, shape index: {}]   ;;  %s2411_s2 = inlined_call_operand.vmem [shape: f32[32,128], index: 2, kind: input, shape index: {}]   ;;  %s2412_s3 = inlined_call_operand.vmem [shape: f32[1,128], index: 3, kind: input, shape index: {}]   ;;  %s2413_s4 = inlined_call_operand.hbm [shape: f32[256,128], index: 4, kind: output, shape index: {}]  }
   0x1   :  { %11 = vsyncpa [#allocation3 + $0x1], 0  ;;  %s1923_s15 = smov 0   ;;  %s1925_s16 = smov 0  }
   0x2   :  { %s1927_s17 = smov 0   ;;  %s1929_s18 = smov 0  }
   0x3 LB: > { %s1944_s19 = sadd.s32 4294967295, %s1891_s18   ;;  %s1579_s20 = sadd.s32 4294967294, %s1891_s18   ;;  %s1891_s18 = sphi %s1929_s18, %s2419_s18   ;;  %s1887_s17 = sphi %s1927_s17, %s2418_s17   ;;  %s1883_s16 = sphi %s1925_s16, %s2417_s16   ;;  %s1879_s15 = sphi %s1923_s15, %s2416_s15  }
   0x4   : > { %s1948_s21 = sadd.s32 1, %s1891_s18   ;;  %s113_s22 = sadd.s32 1, %s1887_s17 }
   0x5   : > { %s110_s23 = ssub.s32 %s1891_s18, %s1948_s21  ;;  %p123_p0 = scmp.ne.s32.totalorder %s1887_s17, %s1883_s16 }
   0x6   : > { %p111_p1 = scmp.eq.s32.totalorder %s110_s23, 0  ;;  %p124_p2 = scmp.eq.s32.totalorder %s1944_s19, 1 }
   0x7   : > { %p129_p3 = scmp.ne.s32.totalorder %s1883_s16, %s1879_s15  ;;  %p130_p4 = scmp.eq.s32.totalorder %s1579_s20, 1 }
   0x8   : > { %s1959_s24 = scalar_select %p111_p1, %s1887_s17, %s113_s22  }
   0x9   : > { %p1961_p5 = por %p124_p2, %p123_p0  ;;  %p1965_p6 = por %p130_p4, %p129_p3 }
   0xa   : > { %p1582_p7 = scmp.ge.s32.totalorder %s1891_s18, 1  ;;  %p166_p8 = scmp.lt.s32.totalorder %s1891_s18, 3 }
   0xc   : > { %p167_p9 = pnand %p1582_p7, %p166_p8 }
   0xd   : > { %s1584_s5 = sshll.u32 (!%p167_p9), %s1944_s19, 4  ;;  %s1893_s14 = smov (!%p167_p9), 96  }
   0xe   : > { %170 = sbr.rel (%p167_p9) target bundleno = 1096 (0x448), region = 36  ;;  %p193_p10 = scmp.lt.s32.totalorder (!%p167_p9), %s1584_s5, 31 }
   0xf   : > { %s1894_s20 = smov (!%p167_p9), 64   ;;  %s189_s7 = sand.u32 (!%p167_p9), 1, %s1883_s16  }
  0x10   : > { %s1583_s8 = sshll.u32 (!%p167_p9), %s189_s7, 7  ;;  %s1671_s12 = sshll.u32 (!%p167_p9), %s1944_s19, 7 }
  0x11   : > { %s2355_s11 = scalar_lea.vmem (!%p167_p9), [#allocation2], %s1583_s8  ;;  %s1502_s27 = scalar_lea.sflag (!%p167_p9), [#allocation3], %s189_s7 }
  0x12   : > { %s1514_s22 = sshll.u32 (!%p167_p9), %s2355_s11, 4  ;;  %s1515_s22 = int_to_ptr.vmem [resolvable:$true] %s1514_s22 }
  0x13   : > { %v218_v0 = vld [vmem:[%s2410_s1 + $0x18] sm:$0xff]  ;;  %v217_v1 = vld [vmem:[%s2410_s1 + $0x10] sm:$0xff]  ;;  %v216_v2 = vld [vmem:[%s2410_s1 + $0x8] sm:$0xff]  ;;  %s2421_s5 = smov (!%p193_p10, %s1584_s5), 31  ;;  %vm219_vm0 = vcmask 261120   ;;  %v333_v61 = vlaneseq  ;;  %vm771_vm2 = vcmask 64512  }
  0x14   : > { %280 = vmatpush.msra.mxu0 %v218_v0  ;;  %v215_v3 = vld [vmem:[%s2410_s1] sm:$0xff]  ;;  %s1585_s10 = sshll.u32 %s2421_s5, 3  ;;  %s1849_s5 = scalar_lea.hbm %s2413_s4, 256 }
  0x15   : > { %s1987_s13 = scalar_lea.vmem %s2409_s0, %s1585_s10  ;;  %v334_v62 = vshrl.u32 %v333_v61, 7  ;;  %v336_v63 = vand.u32 127, %v333_v61 }
  0x16   : > { %281 = vmatpush.msra.mxu0 %v217_v1  ;;  %v199_v4 = vld [vmem:[%s1987_s13] sm:$0xff]  ;;  %v200_v5 = vld [vmem:[%s1987_s13 + $0x8] sm:$0xff]  ;;  %v201_v6 = vld [vmem:[%s1987_s13 + $0x10] sm:$0xff] }
  0x17   : > { %v202_v7 = vld [vmem:[%s1987_s13 + $0x18] sm:$0xff]  ;;  %v203_v8 = vld [vmem:[%s1987_s13 + $0x20] sm:$0xff]  ;;  %v204_v9 = vld [vmem:[%s1987_s13 + $0x28] sm:$0xff]  ;;  %vm337_vm1 = vcmp.le.s32.totalorder %v336_v63, %v334_v62 }
  0x18   : > { %282 = vmatpush.msra.mxu0 %v216_v2  ;;  %v205_v10 = vld [vmem:[%s1987_s13 + $0x30] sm:$0xff]  ;;  %v206_v11 = vld [vmem:[%s1987_s13 + $0x38] sm:$0xff]  ;;  %v207_v12 = vld [vmem:[%s1987_s13 + $0x40] sm:$0xff] }
  0x19   : > { %v208_v13 = vld [vmem:[%s1987_s13 + $0x48] sm:$0xff]  ;;  %v209_v14 = vld [vmem:[%s1987_s13 + $0x50] sm:$0xff]  ;;  %v210_v15 = vld [vmem:[%s1987_s13 + $0x58] sm:$0xff] }
  0x1a   : > { %283 = vmatpush.msra.mxu0 %v215_v3  ;;  %v211_v16 = vld [vmem:[%s1987_s13 + $0x60] sm:$0xff]  ;;  %v212_v17 = vld [vmem:[%s1987_s13 + $0x68] sm:$0xff]  ;;  %v213_v18 = vld [vmem:[%s1987_s13 + $0x70] sm:$0xff]  ;;  %v1895_v3 = vmov -1e+30  }
  0x1b   : > { %1586 = vmatmul.msk.f32.vlgmr.msra.gmra.mxu0 %vm219_vm0, %v199_v4  ;;  %v214_v19 = vld [vmem:[%s1987_s13 + $0x78] sm:$0xff]  ;;  %v2108_v4 = vsel %vm337_vm1, 0.0, %v1895_v3 }
  0x23   : > { %1587 = vmatmul.msk.f32.gmra.mxu0 %vm219_vm0, %v200_v5 }
  0x2b   : > { %1588 = vmatmul.msk.f32.gmra.mxu0 %vm219_vm0, %v201_v6 }
  0x33   : > { %1589 = vmatmul.msk.f32.gmra.mxu0 %vm219_vm0, %v202_v7 }
  0x3b   : > { %1590 = vmatmul.msk.f32.gmra.mxu0 %vm219_vm0, %v203_v8 }
  0x43   : > { %1591 = vmatmul.msk.f32.gmra.mxu0 %vm219_vm0, %v204_v9 }
  0x4b   : > { %1592 = vmatmul.msk.f32.gmra.mxu0 %vm219_vm0, %v205_v10 }
  0x53   : > { %1593 = vmatmul.msk.f32.gmra.mxu0 %vm219_vm0, %v206_v11 }
  0x5b   : > { %1594 = vmatmul.msk.f32.gmra.mxu0 %vm219_vm0, %v207_v12 }
  0x63   : > { %1595 = vmatmul.msk.f32.gmra.mxu0 %vm219_vm0, %v208_v13 }
  0x6b   : > { %1596 = vmatmul.msk.f32.gmra.mxu0 %vm219_vm0, %v209_v14 }
  0x73   : > { %1597 = vmatmul.msk.f32.gmra.mxu0 %vm219_vm0, %v210_v15 }
  0x7b   : > { %1598 = vmatmul.msk.f32.gmra.mxu0 %vm219_vm0, %v211_v16 }
  0x83   : > { %1599 = vmatmul.msk.f32.gmra.mxu0 %vm219_vm0, %v212_v17 }
  0x8b   : > { %1600 = vmatmul.msk.f32.gmra.mxu0 %vm219_vm0, %v213_v18 }
  0x93   : > { %1601 = vmatmul.msk.f32.gmra.mxu0 %vm219_vm0, %v214_v19 }
  0x98   : > { %v285_v20 = vpop.f32.mrf.mxu0 }
  0x99   : > { %340 = vrot.lane.b32.xlu0 %v285_v20, %s1893_s14 }
  0xa0   : > { %v288_v21 = vpop.f32.mrf.mxu0 }
  0xa1   : > { %367 = vrot.lane.b32.xlu0 %v288_v21, %s1893_s14  ;;  %v1724_v37 = vpack.i.bf16 %v288_v21, %v285_v20 }
  0xa8   : > { %v291_v22 = vpop.f32.mrf.mxu0 }
  0xa9   : > { %394 = vrot.lane.b32.xlu1 %v291_v22, %s1893_s14 }
  0xb0   : > { %v294_v23 = vpop.f32.mrf.mxu0 }
  0xb1   : > { %421 = vrot.lane.b32.xlu1 %v294_v23, %s1893_s14 }
  0xb8   : > { %v297_v24 = vpop.f32.mrf.mxu0 }
  0xb9   : > { %448 = vrot.lane.b32.xlu2 %v297_v24, %s1893_s14  ;;  %v1729_v40 = vpack.i.bf16 %v297_v24, %v294_v23 }
  0xc0   : > { %v2026_v25 = vpop.f32.mrf.mxu0 }
  0xc1   : > { %475 = vrot.lane.b32.xlu1 %v2026_v25, %s1893_s14 }
  0xc8   : > { %v303_v26 = vpop.f32.mrf.mxu0 }
  0xc9   : > { %502 = vrot.lane.b32.xlu2 %v303_v26, %s1893_s14  ;;  %v1734_v34 = vpack.i.bf16 %v291_v22, %v303_v26 }
  0xd0   : > { %v306_v27 = vpop.f32.mrf.mxu0 }
  0xd1   : > { %529 = vrot.lane.b32.xlu0 %v306_v27, %s1893_s14 }
  0xd8   : > { %v2032_v28 = vpop.f32.mrf.mxu0 }
  0xd9   : > { %556 = vrot.lane.b32.xlu1 %v2032_v28, %s1893_s14 }
  0xe0   : > { %v312_v29 = vpop.f32.mrf.mxu0 }
  0xe1   : > { %583 = vrot.lane.b32.xlu2 %v312_v29, %s1893_s14  ;;  %v1739_v43 = vpack.i.bf16 %v312_v29, %v306_v27 }
  0xe8   : > { %v2037_v30 = vpop.f32.mrf.mxu0 }
  0xe9   : > { %610 = vrot.lane.b32.xlu0 %v2037_v30, %s1893_s14 }
  0xf0   : > { %v2041_v31 = vpop.f32.mrf.mxu0 }
  0xf1   : > { %637 = vrot.lane.b32.xlu2 %v2041_v31, %s1893_s14 }
  0xf8   : > { %v2045_v32 = vpop.f32.mrf.mxu0 }
  0xf9   : > { %664 = vrot.lane.b32.xlu0 %v2045_v32, %s1893_s14 }
 0x100   : > { %v2049_v33 = vpop.f32.mrf.mxu0 }
 0x101   : > { %691 = vrot.lane.b32.xlu1 %v2049_v33, %s1893_s14 }
 0x108   : > { %v2053_v35 = vpop.f32.mrf.mxu0 }
 0x109   : > { %1735 = vrot.lane.b32.xlu1 %v1734_v34, %s1894_s20  ;;  %718 = vrot.lane.b32.xlu2 %v2053_v35, %s1893_s14 }
 0x10b   : > { %v341_v36 = vpop.permute.xlu0 %340 }
 0x10c   : > { %1602 = vmatpush.xpose.msk.msra.mxu2 %vm219_vm0, %v341_v36 }
 0x10f   : > { %1603 = vmatmul.msk.f32.vlgmr.msra.gmra.mxu2 %vm219_vm0, %v285_v20 }
 0x110   : > { %v2060_v38 = vpop.f32.mrf.mxu0 }
 0x111   : > { %1725 = vrot.lane.b32.xlu2 %v1724_v37, %s1894_s20  ;;  %745 = vrot.lane.b32.xlu0 %v2060_v38, %s1893_s14 }
 0x113   : > { %v368_v39 = vpop.permute.xlu0 %367  ;;  %v449_v41 = vpop.permute.xlu2 %448 }
 0x114   : > { %1604 = vmatpush.xpose.msk.msrb.mxu2 %vm219_vm0, %v368_v39  ;;  %v1744_v39 = vpack.i.bf16 %v2037_v30, %v2026_v25 }
 0x117   : > { %1605 = vmatmul.msk.f32.vlgmr.msrb.gmra.mxu2 %vm219_vm0, %v288_v21 }
 0x119   : > { %1730 = vrot.lane.b32.xlu0 %v1729_v40, %s1894_s20 }
 0x11b   : > { %v395_v42 = vpop.permute.xlu1 %394 }
 0x11c   : > { %1606 = vmatpush.xpose.msk.msra.mxu2 %vm219_vm0, %v395_v42 }
 0x11f   : > { %1607 = vmatmul.msk.f32.vlgmr.msra.gmra.mxu2 %vm219_vm0, %v291_v22 }
 0x120   : > { %1610 = vmatpush.xpose.msk.msrb.mxu2 %vm219_vm0, %v449_v41 }
 0x121   : > { %1740 = vrot.lane.b32.xlu0 %v1739_v43, %s1894_s20 }
 0x123   : > { %v422_v44 = vpop.permute.xlu1 %421  ;;  %v503_v45 = vpop.permute.xlu2 %502 }
 0x124   : > { %1608 = vmatpush.xpose.msk.msra.mxu1 %vm219_vm0, %v422_v44 }
 0x127   : > { %1609 = vmatmul.msk.f32.vlgmr.msra.gmra.mxu1 %vm219_vm0, %v294_v23  ;;  %1611 = vmatmul.msk.f32.vlgmr.msrb.gmra.mxu2 %vm219_vm0, %v297_v24 }
 0x128   : > { %1614 = vmatpush.xpose.msk.msrb.mxu1 %vm219_vm0, %v503_v45 }
 0x12f   : > { %1615 = vmatmul.msk.f32.vlgmr.msrb.gmra.mxu1 %vm219_vm0, %v303_v26 }
 0x133   : > { %v476_v46 = vpop.permute.xlu1 %475 }
 0x134   : > { %1612 = vmatpush.xpose.msk.msra.mxu3 %vm219_vm0, %v476_v46 }
 0x137   : > { %1613 = vmatmul.msk.f32.vlgmr.msra.gmra.mxu3 %vm219_vm0, %v2026_v25 }
 0x13b   : > { %v584_v47 = vpop.permute.xlu2 %583 }
 0x13c   : > { %1620 = vmatpush.xpose.msk.msra.mxu1 %vm219_vm0, %v584_v47 }
 0x13f   : > { %1621 = vmatmul.msk.f32.vlgmr.msra.gmra.mxu1 %vm219_vm0, %v312_v29 }
 0x143   : > { %v530_v48 = vpop.permute.xlu0 %529 }
 0x144   : > { %1616 = vmatpush.xpose.msk.msra.mxu2 %vm219_vm0, %v530_v48 }
 0x147   : > { %1617 = vmatmul.msk.f32.vlgmr.msra.gmra.mxu2 %vm219_vm0, %v306_v27 }
 0x14b   : > { %v557_v49 = vpop.permute.xlu1 %556  ;;  %v638_v50 = vpop.permute.xlu2 %637 }
 0x14c   : > { %1618 = vmatpush.xpose.msk.msrb.mxu3 %vm219_vm0, %v557_v49 }
 0x14f   : > { %1619 = vmatmul.msk.f32.vlgmr.msrb.gmra.mxu3 %vm219_vm0, %v2032_v28 }
 0x150   : > { %1624 = vmatpush.xpose.msk.msra.mxu3 %vm219_vm0, %v638_v50 }
 0x157   : > { %1625 = vmatmul.msk.f32.vlgmr.msra.gmra.mxu3 %vm219_vm0, %v2041_v31 }
 0x15b   : > { %v611_v51 = vpop.permute.xlu0 %610 }
 0x15c   : > { %1622 = vmatpush.xpose.msk.msrb.mxu2 %vm219_vm0, %v611_v51 }
 0x15f   : > { %1623 = vmatmul.msk.f32.vlgmr.msrb.gmra.mxu2 %vm219_vm0, %v2037_v30 }
 0x163   : > { %v719_v52 = vpop.permute.xlu2 %718 }
 0x164   : > { %1630 = vmatpush.xpose.msk.msrb.mxu3 %vm219_vm0, %v719_v52 }
 0x167   : > { %1631 = vmatmul.msk.f32.vlgmr.msrb.gmra.mxu3 %vm219_vm0, %v2053_v35 }
 0x16b   : > { %v665_v53 = vpop.permute.xlu0 %664  ;;  %v1726_v54 = vpop.permute.xlu2 %1725 }
 0x16c   : > { %v1728_v55 = vunpack.i.h.bf16 %v1726_v54  ;;  %1626 = vmatpush.xpose.msk.msrb.mxu1 %vm219_vm0, %v665_v53  ;;  %v1727_v56 = vunpack.i.l.bf16 %v1726_v54 }
 0x16e   : > { %995 = vmatpush.msra.mxu3 %v1728_v55 }
 0x16f   : > { %1627 = vmatmul.msk.f32.vlgmr.msrb.gmra.mxu1 %vm219_vm0, %v2045_v32 }
 0x173   : > { %v692_v57 = vpop.permute.xlu1 %691 }
 0x174   : > { %1628 = vmatpush.xpose.msk.msra.mxu2 %vm219_vm0, %v692_v57 }
 0x177   : > { %1629 = vmatmul.msk.f32.vlgmr.msra.gmra.mxu2 %vm219_vm0, %v2049_v33 }
 0x178   : > { %969 = vmatpush.msrb.mxu2 %v1727_v56 }
 0x17b   : > { %v2102_v58 = vpop.permute.xlu1 %1735 }
 0x17c   : > { %v1738_v59 = vunpack.i.h.bf16 %v2102_v58 }
 0x183   : > { %v746_v60 = vpop.permute.xlu0 %745 }
 0x184   : > { %1632 = vmatpush.xpose.msk.msra.mxu1 %vm219_vm0, %v746_v60 }
 0x187   : > { %1633 = vmatmul.msk.f32.vlgmr.msra.gmra.mxu1 %vm219_vm0, %v2060_v38 }
 0x188   : > { %1021 = vmatpush.msrb.mxu1 %v1738_v59 }
 0x18b   : > { %v1731_v0 = vpop.permute.xlu0 %1730 }
 0x18c   : > { %v1733_v1 = vunpack.i.h.bf16 %v1731_v0  ;;  %v1732_v2 = vunpack.i.l.bf16 %v1731_v0 }
 0x18e   : > { %1047 = vmatpush.msra.mxu2 %v1732_v2  ;;  %1073 = vmatpush.msrb.mxu3 %v1733_v1 }
 0x192   : > { %v363_v5 = vpop.f32.mrf.mxu2 }
 0x193   : > { %v2111_v6 = vadd.f32 %v363_v5, %v2108_v4  ;;  %v2195_v2 = vpop.permute.xlu0 %1740 }
 0x195   : > { %v772_v7 = vsel %vm771_vm2, %v2111_v6, -inf }
 0x196   : > { %773 = vmax.xlane.f32.xlu1 %v772_v7 }
 0x19a   : > { %v390_v8 = vpop.f32.mrf.mxu2 }
 0x19b   : > { %v2116_v9 = vadd.f32 %v390_v8, %v2108_v4 }
 0x19d   : > { %v775_v10 = vsel %vm771_vm2, %v2116_v9, -inf }
 0x19e   : > { %776 = vmax.xlane.f32.xlu2 %v775_v10 }
 0x1a2   : > { %v417_v11 = vpop.f32.mrf.mxu2 }
 0x1a3   : > { %v2121_v12 = vadd.f32 %v417_v11, %v2108_v4 }
 0x1a4   : > { %v444_v13 = vpop.f32.mrf.mxu1 }
 0x1a5   : > { %v2124_v14 = vadd.f32 %v444_v13, %v2108_v4  ;;  %v778_v15 = vsel %vm771_vm2, %v2121_v12, -inf }
 0x1a6   : > { %779 = vmax.xlane.f32.xlu2 %v778_v15 }
 0x1a7   : > { %v781_v16 = vsel %vm771_vm2, %v2124_v14, -inf }
 0x1a8   : > { %782 = vmax.xlane.f32.xlu0 %v781_v16 }
 0x1aa   : > { %v471_v17 = vpop.f32.mrf.mxu2 }
 0x1ab   : > { %v2131_v18 = vadd.f32 %v471_v17, %v2108_v4 }
 0x1ac   : > { %v525_v19 = vpop.f32.mrf.mxu1 }
 0x1ad   : > { %v2134_v20 = vadd.f32 %v525_v19, %v2108_v4  ;;  %v784_v21 = vsel %vm771_vm2, %v2131_v18, -inf }
 0x1ae   : > { %785 = vmax.xlane.f32.xlu2 %v784_v21 }
 0x1af   : > { %v790_v22 = vsel %vm771_vm2, %v2134_v20, -inf }
 0x1b0   : > { %791 = vmax.xlane.f32.xlu1 %v790_v22 }
 0x1ba   : > { %v498_v23 = vpop.f32.mrf.mxu3 }
 0x1bb   : > { %v2141_v24 = vadd.f32 %v498_v23, %v2108_v4 }
 0x1bc   : > { %v606_v41 = vpop.f32.mrf.mxu1 }
 0x1bd   : > { %v787_v26 = vsel %vm771_vm2, %v2141_v24, -inf  ;;  %v2159_v42 = vadd.f32 %v606_v41, %v2108_v4 }
 0x1be   : > { %788 = vmax.xlane.f32.xlu2 %v787_v26 }
 0x1bf   : > { %v799_v43 = vsel %vm771_vm2, %v2159_v42, -inf }
 0x1ca   : > { %v552_v27 = vpop.f32.mrf.mxu2 }
 0x1cb   : > { %v2146_v29 = vadd.f32 %v552_v27, %v2108_v4 }
 0x1cd   : > { %v793_v34 = vsel %vm771_vm2, %v2146_v29, -inf }
 0x1ce   : > { %794 = vmax.xlane.f32.xlu0 %v793_v34 }
 0x1d2   : > { %v579_v36 = vpop.f32.mrf.mxu3 }
 0x1d3   : > { %v2151_v37 = vadd.f32 %v579_v36, %v2108_v4 }
 0x1d5   : > { %v796_v40 = vsel %vm771_vm2, %v2151_v37, -inf }
 0x1d6   : > { %797 = vmax.xlane.f32.xlu1 %v796_v40  ;;  %1745 = vrot.lane.b32.xlu2 %v1744_v39, %s1894_s20 }
 0x1da   : > { %v660_v44 = vpop.f32.mrf.mxu3 }
 0x1db   : > { %v2179_v52 = vadd.f32 %v660_v44, %v2108_v4 }
 0x1dd   : > { %v805_v53 = vsel %vm771_vm2, %v2179_v52, -inf }
 0x1de   : > { %800 = vmax.xlane.f32.xlu1 %v799_v43 }
 0x1e2   : > { %v633_v45 = vpop.f32.mrf.mxu2 }
 0x1e3   : > { %v2164_v46 = vadd.f32 %v633_v45, %v2108_v4 }
 0x1e5   : > { %v802_v25 = vsel %vm771_vm2, %v2164_v46, -inf }
 0x1e6   : > { %803 = vmax.xlane.f32.xlu0 %v802_v25 }
 0x1ea   : > { %v741_v30 = vpop.f32.mrf.mxu3 }
 0x1eb   : > { %v2169_v47 = vadd.f32 %v741_v30, %v2108_v4 }
 0x1ec   : > { %v687_v48 = vpop.f32.mrf.mxu1 }
 0x1ed   : > { %v2172_v49 = vadd.f32 %v687_v48, %v2108_v4  ;;  %v814_v50 = vsel %vm771_vm2, %v2169_v47, -inf }
 0x1ee   : > { %815 = vmax.xlane.f32.xlu1 %v814_v50 }
 0x1ef   : > { %v808_v51 = vsel %vm771_vm2, %v2172_v49, -inf }
 0x1f0   : > { %809 = vmax.xlane.f32.xlu0 %v808_v51 }
 0x1fa   : > { %v714_v54 = vpop.f32.mrf.mxu2 }
 0x1fb   : > { %v2184_v55 = vadd.f32 %v714_v54, %v2108_v4 }
 0x1fd   : > { %v811_v59 = vsel %vm771_vm2, %v2184_v55, -inf }
 0x1ff   : > { %806 = vmax.xlane.f32.xlu2 %v805_v53 }
 0x204   : > { %v768_v56 = vpop.f32.mrf.mxu1 }
 0x205   : > { %v2187_v57 = vadd.f32 %v768_v56, %v2108_v4 }
 0x207   : > { %812 = vmax.xlane.f32.xlu2 %v811_v59  ;;  %v817_v60 = vsel %vm771_vm2, %v2187_v57, -inf }
 0x208   : > { %818 = vmax.xlane.f32.xlu1 %v817_v60 }
 0x209   : > { %v774_v61 = vpop.xlane.xlu1 %773 }
 0x20a   : > { %v820_v62 = vsub.f32 %v2111_v6, %v774_v61 }
 0x20c   : > { %v836_v63 = vmul.f32 1.442695, %v820_v62 }
 0x20e   : > { %1765 = vpow2.f32 %v836_v63 }
 0x211   : > { %v777_v0 = vpop.xlane.xlu2 %776 }
 0x212   : > { %v821_v1 = vsub.f32 %v2116_v9, %v777_v0 }
 0x214   : > { %v2197_v3 = vpop.eup %1765  ;;  %v838_v4 = vmul.f32 1.442695, %v821_v1 }
 0x215   : > { %v868_v5 = vsel %vm771_vm2, %v2197_v3, 0.0 }
 0x216   : > { %1767 = vpow2.f32 %v838_v4  ;;  %869 = vadd.xlane.f32.xlu1 %v868_v5 }
 0x219   : > { %v780_v7 = vpop.xlane.xlu2 %779 }
 0x21a   : > { %v822_v8 = vsub.f32 %v2121_v12, %v780_v7 }
 0x21b   : > { %v783_v10 = vpop.xlane.xlu0 %782 }
 0x21c   : > { %v2202_v6 = vpop.eup %1767  ;;  %v840_v11 = vmul.f32 1.442695, %v822_v8  ;;  %v823_v13 = vsub.f32 %v2124_v14, %v783_v10  ;;  %v1749_v10 = vpack.i.bf16 %v2041_v31, %v2032_v28 }
 0x21d   : > { %v871_v9 = vsel %vm771_vm2, %v2202_v6, 0.0 }
 0x21e   : > { %1769 = vpow2.f32 %v840_v11  ;;  %v842_v15 = vmul.f32 1.442695, %v823_v13  ;;  %872 = vadd.xlane.f32.xlu0 %v871_v9 }
 0x220   : > { %1771 = vpow2.f32 %v842_v15 }
 0x221   : > { %v786_v16 = vpop.xlane.xlu2 %785 }
 0x222   : > { %v824_v17 = vsub.f32 %v2131_v18, %v786_v16 }
 0x223   : > { %v792_v18 = vpop.xlane.xlu1 %791 }
 0x224   : > { %v2208_v19 = vpop.eup %1769  ;;  %v844_v21 = vmul.f32 1.442695, %v824_v17  ;;  %v826_v36 = vsub.f32 %v2134_v20, %v792_v18 }
 0x225   : > { %v874_v12 = vsel %vm771_vm2, %v2208_v19, 0.0 }
 0x226   : > { %v2212_v22 = vpop.eup %1771  ;;  %1773 = vpow2.f32 %v844_v21  ;;  %875 = vadd.xlane.f32.xlu2 %v874_v12  ;;  %v848_v40 = vmul.f32 1.442695, %v826_v36  ;;  %v1759_v36 = vpack.i.bf16 %v2060_v38, %v2053_v35 }
 0x227   : > { %v877_v14 = vsel %vm771_vm2, %v2212_v22, 0.0 }
 0x228   : > { %878 = vadd.xlane.f32.xlu1 %v877_v14 }
 0x22c   : > { %v2216_v23 = vpop.eup %1773 }
 0x22d   : > { %v880_v26 = vsel %vm771_vm2, %v2216_v23, 0.0 }
 0x22e   : > { %881 = vadd.xlane.f32.xlu0 %v880_v26 }
 0x231   : > { %v789_v27 = vpop.xlane.xlu2 %788 }
 0x232   : > { %v825_v34 = vsub.f32 %v2141_v24, %v789_v27 }
 0x234   : > { %v846_v39 = vmul.f32 1.442695, %v825_v34 }
 0x236   : > { %1775 = vpow2.f32 %v846_v39 }
 0x237   : > { %1777 = vpow2.f32 %v848_v40 }
 0x239   : > { %v2222_v41 = vpop.permute.xlu2 %1745 }
 0x23a   : > { %v1747_v43 = vunpack.i.l.bf16 %v2222_v41 }
 0x23c   : > { %v2225_v44 = vpop.eup %1775  ;;  %1099 = vmatpush.msra.mxu1 %v1747_v43 }
 0x23d   : > { %v883_v45 = vsel %vm771_vm2, %v2225_v44, 0.0  ;;  %v2229_v30 = vpop.eup %1777 }
 0x23e   : > { %884 = vadd.xlane.f32.xlu1 %v883_v45  ;;  %v886_v48 = vsel %vm771_vm2, %v2229_v30, 0.0 }
 0x241   : > { %v795_v25 = vpop.xlane.xlu0 %794 }
 0x242   : > { %v827_v20 = vsub.f32 %v2146_v29, %v795_v25  ;;  %v1737_v25 = vunpack.i.l.bf16 %v2102_v58 }
 0x244   : > { %v850_v24 = vmul.f32 1.442695, %v827_v20 }
 0x246   : > { %1779 = vpow2.f32 %v850_v24  ;;  %887 = vadd.xlane.f32.xlu1 %v886_v48  ;;  %v1742_v24 = vunpack.i.l.bf16 %v2195_v2 }
 0x249   : > { %v798_v50 = vpop.xlane.xlu1 %797 }
 0x24a   : > { %v828_v51 = vsub.f32 %v2151_v37, %v798_v50 }
 0x24c   : > { %v2235_v53 = vpop.eup %1779  ;;  %v852_v54 = vmul.f32 1.442695, %v828_v51 }
 0x24d   : > { %v889_v56 = vsel %vm771_vm2, %v2235_v53, 0.0 }
 0x24e   : > { %1781 = vpow2.f32 %v852_v54  ;;  %890 = vadd.xlane.f32.xlu1 %v889_v56  ;;  %v1748_v56 = vunpack.i.h.bf16 %v2222_v41 }
 0x251   : > { %v801_v59 = vpop.xlane.xlu1 %800 }
 0x252   : > { %v829_v29 = vsub.f32 %v2159_v42, %v801_v59 }
 0x254   : > { %v2240_v60 = vpop.eup %1781  ;;  %v854_v61 = vmul.f32 1.442695, %v829_v29 }
 0x255   : > { %v892_v62 = vsel %vm771_vm2, %v2240_v60, 0.0 }
 0x256   : > { %1783 = vpow2.f32 %v854_v61  ;;  %893 = vadd.xlane.f32.xlu2 %v892_v62 }
 0x259   : > { %v804_v37 = vpop.xlane.xlu0 %803 }
 0x25a   : > { %v830_v63 = vsub.f32 %v2164_v46, %v804_v37 }
 0x25c   : > { %v2245_v0 = vpop.eup %1783  ;;  %v856_v1 = vmul.f32 1.442695, %v830_v63 }
 0x25d   : > { %v895_v4 = vsel %vm771_vm2, %v2245_v0, 0.0 }
 0x25e   : > { %1785 = vpow2.f32 %v856_v1  ;;  %896 = vadd.xlane.f32.xlu0 %v895_v4 }
 0x261   : > { %v816_v42 = vpop.xlane.xlu1 %815 }
 0x262   : > { %v834_v11 = vsub.f32 %v2169_v47, %v816_v42 }
 0x263   : > { %v810_v5 = vpop.xlane.xlu0 %809 }
 0x264   : > { %v2249_v7 = vpop.eup %1785  ;;  %v832_v8 = vsub.f32 %v2172_v49, %v810_v5  ;;  %v864_v9 = vmul.f32 1.442695, %v834_v11 }
 0x265   : > { %v898_v46 = vsel %vm771_vm2, %v2249_v7, 0.0 }
 0x266   : > { %v860_v13 = vmul.f32 1.442695, %v832_v8  ;;  %899 = vadd.xlane.f32.xlu2 %v898_v46 }
 0x267   : > { %1750 = vrot.lane.b32.xlu1 %v1749_v10, %s1894_s20 }
 0x268   : > { %1787 = vpow2.f32 %v860_v13 }
 0x269   : > { %1789 = vpow2.f32 %v864_v9 }
 0x26e   : > { %v2258_v15 = vpop.eup %1787 }
 0x26f   : > { %v904_v49 = vsel %vm771_vm2, %v2258_v15, 0.0  ;;  %v2263_v31 = vpop.eup %1789 }
 0x270   : > { %905 = vadd.xlane.f32.xlu2 %v904_v49  ;;  %v910_v47 = vsel %vm771_vm2, %v2263_v31, 0.0 }
 0x272   : > { %v807_v16 = vpop.xlane.xlu2 %806 }
 0x273   : > { %v831_v28 = vsub.f32 %v2179_v52, %v807_v16 }
 0x275   : > { %v858_v17 = vmul.f32 1.442695, %v831_v28 }
 0x277   : > { %1791 = vpow2.f32 %v858_v17 }
 0x278   : > { %911 = vadd.xlane.f32.xlu2 %v910_v47 }
 0x27a   : > { %v813_v21 = vpop.xlane.xlu2 %812 }
 0x27b   : > { %v833_v26 = vsub.f32 %v2184_v55, %v813_v21  ;;  %v819_v18 = vpop.xlane.xlu1 %818  ;;  %v1754_v55 = vpack.i.bf16 %v2049_v33, %v2045_v32  ;;  %v1367_v21 = vld [vmem:[%s2411_s2 + $0x18] sm:$0xff] }
 0x27c   : > { %v835_v59 = vsub.f32 %v2187_v57, %v819_v18 }
 0x27d   : > { %v2267_v12 = vpop.eup %1791  ;;  %v862_v27 = vmul.f32 1.442695, %v833_v26 }
 0x27e   : > { %v901_v14 = vsel %vm771_vm2, %v2267_v12, 0.0 }
 0x27f   : > { %902 = vadd.xlane.f32.xlu0 %v901_v14  ;;  %1793 = vpow2.f32 %v862_v27  ;;  %v1365_v14 = vld [vmem:[%s2411_s2 + $0x8] sm:$0xff] }
 0x285   : > { %v2272_v34 = vpop.eup %1793 }
 0x286   : > { %v907_v40 = vsel %vm771_vm2, %v2272_v34, 0.0 }
 0x289   : > { %v870_v52 = vpop.xlane.xlu1 %869 }
 0x28a   : > { %1795 = vrcp.f32 %v870_v52 }
 0x290   : > { %v1796_v39 = vpop.eup %1795  ;;  %1760 = vrot.lane.b32.xlu2 %v1759_v36, %s1894_s20 }
 0x291   : > { %v932_v43 = vmul.f32 %v1796_v39, %v2197_v3  ;;  %908 = vadd.xlane.f32.xlu1 %v907_v40  ;;  %v873_v45 = vpop.xlane.xlu0 %872 }
 0x292   : > { %1797 = vrcp.f32 %v873_v45 }
 0x293   : > { %1755 = vrot.lane.b32.xlu0 %v1754_v55, %s1894_s20  ;;  %1634 = vmatmul.msk.f32.vlgmr.msrb.gmra.mxu2 %vm771_vm2, %v932_v43  ;;  %s1513_s20 = scalar_lea.hbm %s2413_s4, %s1671_s12 }
 0x294   : > { %1125 = vmatpush.msrb.mxu2 %v1737_v25  ;;  %s1516_s23 = sshll.u32 %s1513_s20, 4  ;;  %s1517_s23 = int_to_ptr.hbm [resolvable:$true] %s1516_s23 }
 0x295   : > { %s1843_s28 = sshra.s32 %s1517_s23, 4  ;;  %s1844_s28 = int_to_ptr.hbm [resolvable:$true] %s1843_s28 }
 0x296   : > { %s1845_s29 = scalar_lea.hbm %s1844_s28, 128  ;;  %p1850_p0 = scmp.lt.s32.totalorder %s1844_s28, %s2413_s4 }
 0x297   : > { %p1846_p11 = scmp.ne.s32.totalorder %s1844_s28, %s1845_s29  ;;  %p1851_p1 = scmp.lt.s32.totalorder %s1849_s5, %s1845_s29 }
 0x298   : > { %v1798_v35 = vpop.eup %1797 }
 0x299   : > { %v933_v38 = vmul.f32 %v1798_v35, %v2202_v6  ;;  %v876_v20 = vpop.xlane.xlu2 %875  ;;  %v1743_v6 = vunpack.i.h.bf16 %v2195_v2  ;;  %p1847_p12 = pnand %p1846_p11, %p1961_p5  ;;  %p1852_p2 = por %p1851_p1, %p1850_p0 }
 0x29a   : > { %1799 = vrcp.f32 %v876_v20 }
 0x29b   : > { %v879_v32 = vpop.xlane.xlu1 %878  ;;  %1635 = vmatmul.msk.f32.vlgmr.msra.gmra.mxu3 %vm771_vm2, %v933_v38  ;;  %p1848_p13 = pneg %p1847_p12 }
 0x29c   : > { %1801 = vrcp.f32 %v879_v32  ;;  %1151 = vmatpush.msra.mxu3 %v1742_v24 }
 0x29d   : > { %p1853_p3 = pnand %p1852_p2, %p1848_p13 }
 0x2a0   : > { %v1800_v33 = vpop.eup %1799 }
 0x2a1   : > { %v934_v58 = vmul.f32 %v1800_v33, %v2208_v19  ;;  %v882_v3 = vpop.xlane.xlu0 %881  ;;  %v866_v19 = vmul.f32 1.442695, %v835_v59  ;;  %v1764_v59 = vld [vmem:[%s2412_s3] ss:$0 sm:$0xff] }
 0x2a2   : > { %v1802_v48 = vpop.eup %1801  ;;  %1803 = vrcp.f32 %v882_v3 }
 0x2a3   : > { %v935_v50 = vmul.f32 %v1802_v48, %v2212_v22  ;;  %1636 = vmatmul.msk.f32.vlgmr.msrb.gmra.mxu1 %vm771_vm2, %v934_v58 }
 0x2a5   : > { %1637 = vmatmul.msk.f32.vlgmr.msra.gmra.mxu2 %vm771_vm2, %v935_v50 }
 0x2a6   : > { %1203 = vmatpush.msra.mxu2 %v1743_v6 }
 0x2a8   : > { %v1804_v51 = vpop.eup %1803 }
 0x2a9   : > { %v936_v54 = vmul.f32 %v1804_v51, %v2216_v23 }
 0x2ab   : > { %1638 = vmatmul.msk.f32.vlgmr.msrb.gmra.mxu3 %vm771_vm2, %v936_v54 }
 0x2ac   : > { %1229 = vmatpush.msrb.mxu3 %v1748_v56 }
 0x2b1   : > { %v885_v29 = vpop.xlane.xlu1 %884 }
 0x2b2   : > { %1805 = vrcp.f32 %v885_v29 }
 0x2b3   : > { %1807 = vpow2.f32 %v866_v19 }
 0x2b8   : > { %v1806_v22 = vpop.eup %1805 }
 0x2b9   : > { %v2297_v61 = vpop.eup %1807  ;;  %v937_v2 = vmul.f32 %v1806_v22, %v2225_v44  ;;  %v888_v62 = vpop.xlane.xlu1 %887 }
 0x2ba   : > { %1809 = vrcp.f32 %v888_v62  ;;  %v913_v23 = vsel %vm771_vm2, %v2297_v61, 0.0 }
 0x2bb   : > { %1639 = vmatmul.msk.f32.vlgmr.msra.gmra.mxu1 %vm771_vm2, %v937_v2 }
 0x2bd   : > { %914 = vadd.xlane.f32.xlu0 %v913_v23 }
 0x2c0   : > { %v1810_v57 = vpop.eup %1809 }
 0x2c1   : > { %v938_v41 = vmul.f32 %v1810_v57, %v2229_v30  ;;  %v891_v37 = vpop.xlane.xlu1 %890 }
 0x2c2   : > { %1811 = vrcp.f32 %v891_v37 }
 0x2c3   : > { %1640 = vmatmul.msk.f32.vlgmr.msrb.gmra.mxu2 %vm771_vm2, %v938_v41 }
 0x2c8   : > { %v1812_v63 = vpop.eup %1811 }
 0x2c9   : > { %v939_v1 = vmul.f32 %v1812_v63, %v2235_v53  ;;  %v894_v44 = vpop.xlane.xlu2 %893 }
 0x2ca   : > { %1813 = vrcp.f32 %v894_v44 }
 0x2cb   : > { %1641 = vmatmul.msk.f32.vlgmr.msra.gmra.mxu3 %vm771_vm2, %v939_v1 }
 0x2d0   : > { %v1814_v42 = vpop.eup %1813 }
 0x2d1   : > { %v897_v4 = vpop.xlane.xlu0 %896  ;;  %v940_v13 = vmul.f32 %v1814_v42, %v2240_v60 }
 0x2d2   : > { %1815 = vrcp.f32 %v897_v4 }
 0x2d8   : > { %v1816_v5 = vpop.eup %1815 }
 0x2d9   : > { %v941_v8 = vmul.f32 %v1816_v5, %v2245_v0  ;;  %v1751_v10 = vpop.permute.xlu1 %1750  ;;  %v900_v46 = vpop.xlane.xlu2 %899 }
 0x2da   : > { %v1753_v30 = vunpack.i.h.bf16 %v1751_v10  ;;  %v1752_v11 = vunpack.i.l.bf16 %v1751_v10  ;;  %1817 = vrcp.f32 %v900_v46 }
 0x2db   : > { %1643 = vmatmul.msk.f32.vlgmr.msra.gmra.mxu2 %vm771_vm2, %v941_v8 }
 0x2dc   : > { %1177 = vmatpush.msrb.mxu1 %v1752_v11 }
 0x2dd   : > { %1642 = vmatmul.msk.f32.vlgmr.msrb.gmra.mxu1 %vm771_vm2, %v940_v13 }
 0x2de   : > { %1255 = vmatpush.msra.mxu1 %v1753_v30 }
 0x2e0   : > { %v1818_v53 = vpop.eup %1817 }
 0x2e1   : > { %v942_v9 = vmul.f32 %v1818_v53, %v2249_v7  ;;  %v1366_v7 = vld [vmem:[%s2411_s2 + $0x10] sm:$0xff] }
 0x2e3   : > { %v906_v49 = vpop.xlane.xlu2 %905  ;;  %1644 = vmatmul.msk.f32.vlgmr.msrb.gmra.mxu3 %vm771_vm2, %v942_v9 }
 0x2eb   : > { %v912_v0 = vpop.xlane.xlu2 %911 }
 0x2f2   : > { %v903_v16 = vpop.xlane.xlu0 %902 }
 0x2f3   : > { %1819 = vrcp.f32 %v903_v16  ;;  %v1761_v28 = vpop.permute.xlu2 %1760 }
 0x2f4   : > { %v1762_v17 = vunpack.i.l.bf16 %v1761_v28  ;;  %1821 = vrcp.f32 %v912_v0  ;;  %v1763_v43 = vunpack.i.h.bf16 %v1761_v28 }
 0x2f5   : > { %1823 = vrcp.f32 %v906_v49 }
 0x2f6   : > { %1333 = vmatpush.msrb.mxu1 %v1762_v17 }
 0x2f9   : > { %v1820_v47 = vpop.eup %1819 }
 0x2fa   : > { %v943_v60 = vmul.f32 %v1820_v47, %v2267_v12  ;;  %v1822_v26 = vpop.eup %1821  ;;  %v1364_v12 = vld [vmem:[%s2411_s2] sm:$0xff] }
 0x2fb   : > { %v946_v18 = vmul.f32 %v1822_v26, %v2263_v31  ;;  %v1824_v27 = vpop.eup %1823 }
 0x2fc   : > { %1645 = vmatmul.msk.f32.vlgmr.msra.gmra.mxu1 %vm771_vm2, %v943_v60  ;;  %v944_v55 = vmul.f32 %v1824_v27, %v2258_v15 }
 0x2fd   : > { %1432 = vmatpush.msra.mxu1 %v1367_v21 }
 0x2ff   : > { %1433 = vmatpush.msra.mxu1 %v1366_v7 }
 0x301   : > { %1434 = vmatpush.msra.mxu1 %v1365_v14 }
 0x303   : > { %1435 = vmatpush.msra.mxu1 %v1364_v12 }
 0x304   : > { %v909_v52 = vpop.xlane.xlu1 %908  ;;  %1648 = vmatmul.msk.f32.vlgmr.msrb.gmra.mxu1 %vm771_vm2, %v946_v18 }
 0x305   : > { %1825 = vrcp.f32 %v909_v52  ;;  %v1756_v36 = vpop.permute.xlu0 %1755 }
 0x306   : > { %v1758_v39 = vunpack.i.h.bf16 %v1756_v36  ;;  %v1757_v40 = vunpack.i.l.bf16 %v1756_v36 }
 0x308   : > { %1281 = vmatpush.msrb.mxu2 %v1757_v40  ;;  %1307 = vmatpush.msra.mxu3 %v1758_v39 }
 0x309   : > { %1646 = vmatmul.msk.f32.vlgmr.msrb.gmra.mxu2 %vm771_vm2, %v944_v55 }
 0x30a   : > { %1673 = vmatpush.msrb.mxu3 %v1367_v21  ;;  %1359 = vmatpush.msra.mxu2 %v1763_v43 }
 0x30b   : > { %v1826_v45 = vpop.eup %1825 }
 0x30c   : > { %1672 = vmatpush.msrb.mxu2 %v1367_v21  ;;  %1675 = vmatpush.msrb.mxu3 %v1366_v7  ;;  %v945_v31 = vmul.f32 %v1826_v45, %v2272_v34 }
 0x30e   : > { %1674 = vmatpush.msrb.mxu2 %v1366_v7  ;;  %1677 = vmatpush.msrb.mxu3 %v1365_v14 }
 0x30f   : > { %1647 = vmatmul.msk.f32.vlgmr.msra.gmra.mxu3 %vm771_vm2, %v945_v31 }
 0x310   : > { %1676 = vmatpush.msrb.mxu2 %v1365_v14  ;;  %1679 = vmatpush.msrb.mxu3 %v1364_v12 }
 0x312   : > { %1678 = vmatpush.msrb.mxu2 %v1364_v12 }
 0x316   : > { %v971_v15 = vpop.f32.mrf.mxu2 }
 0x317   : > { %1650 = vmatmul.msk.f32.vlgmr.msra.gmra.mxu1 %vm219_vm0, %v971_v15 }
 0x31e   : > { %v997_v25 = vpop.f32.mrf.mxu3 }
 0x31f   : > { %1651 = vmatmul.msk.f32.gmra.mxu1 %vm219_vm0, %v997_v25 }
 0x320   : > { %v1023_v35 = vpop.f32.mrf.mxu1 }
 0x327   : > { %1652 = vmatmul.msk.f32.gmra.mxu1 %vm219_vm0, %v1023_v35 }
 0x328   : > { %v1049_v38 = vpop.f32.mrf.mxu2 }
 0x32e   : > { %v1075_v20 = vpop.f32.mrf.mxu3 }
 0x32f   : > { %1653 = vmatmul.msk.f32.gmra.mxu1 %vm219_vm0, %v1049_v38 }
 0x330   : > { %v915_v34 = vpop.xlane.xlu0 %914 }
 0x331   : > { %1827 = vrcp.f32 %v915_v34 }
 0x337   : > { %v1828_v24 = vpop.eup %1827  ;;  %1654 = vmatmul.msk.f32.gmra.mxu1 %vm219_vm0, %v1075_v20 }
 0x338   : > { %v947_v32 = vmul.f32 %v1828_v24, %v2297_v61  ;;  %v1101_v33 = vpop.f32.mrf.mxu1 }
 0x33a   : > { %1649 = vmatmul.msk.f32.vlgmr.msra.gmra.mxu2 %vm771_vm2, %v947_v32 }
 0x33f   : > { %1655 = vmatmul.msk.f32.gmra.mxu1 %vm219_vm0, %v1101_v33 }
 0x346   : > { %v1127_v58 = vpop.f32.mrf.mxu2 }
 0x347   : > { %1656 = vmatmul.msk.f32.vlgmr.msrb.gmra.mxu2 %vm219_vm0, %v1127_v58 }
 0x34e   : > { %v1153_v3 = vpop.f32.mrf.mxu3 }
 0x34f   : > { %1657 = vmatmul.msk.f32.gmra.mxu2 %vm219_vm0, %v1153_v3 }
 0x35a   : > { %v1179_v48 = vpop.f32.mrf.mxu1 }
 0x35b   : > { %1658 = vmatmul.msk.f32.gmra.mxu2 %vm219_vm0, %v1179_v48 }
 0x35e   : > { %v1205_v50 = vpop.f32.mrf.mxu2 }
 0x35f   : > { %1659 = vmatmul.msk.f32.vlgmr.msrb.gmra.mxu3 %vm219_vm0, %v1205_v50 }
 0x366   : > { %v1231_v6 = vpop.f32.mrf.mxu3 }
 0x367   : > { %1660 = vmatmul.msk.f32.gmra.mxu3 %vm219_vm0, %v1231_v6 }
 0x379   : > { %v1257_v51 = vpop.f32.mrf.mxu1 }
 0x37a   : > { %1661 = vmatmul.msk.f32.gmra.mxu3 %vm219_vm0, %v1257_v51 }
 0x381   : > { %v1335_v54 = vpop.f32.mrf.mxu1 }
 0x38c   : > { %v1283_v56 = vpop.f32.mrf.mxu2 }
 0x38d   : > { %1662 = vmatmul.msk.f32.gmra.mxu3 %vm219_vm0, %v1283_v56 }
 0x392   : > { %v1309_v19 = vpop.f32.mrf.mxu3 }
 0x394   : > { %v1437_v29 = vpop.f32.mrf.mxu1 }
 0x395   : > { %v1438_v22 = vadd.f32 %v1764_v59, %v1437_v29  ;;  %1663 = vmatmul.msk.f32.gmra.mxu3 %vm219_vm0, %v1309_v19 }
 0x397   : > { %1485 = vst [vmem:[%s2355_s11] sm:$0xff] %v1438_v22 }
 0x39c   : > { %v1440_v61 = vpop.f32.mrf.mxu1 }
 0x39d   : > { %v1441_v2 = vadd.f32 %v1764_v59, %v1440_v61  ;;  %1664 = vmatmul.msk.f32.gmra.mxu3 %vm219_vm0, %v1335_v54 }
 0x39f   : > { %1486 = vst [vmem:[%s2355_s11 + $0x8] sm:$0xff] %v1441_v2 }
 0x3a4   : > { %v1443_v62 = vpop.f32.mrf.mxu1 }
 0x3a5   : > { %v1444_v23 = vadd.f32 %v1764_v59, %v1443_v62 }
 0x3a7   : > { %1487 = vst [vmem:[%s2355_s11 + $0x10] sm:$0xff] %v1444_v23 }
 0x3ac   : > { %v1446_v57 = vpop.f32.mrf.mxu1 }
 0x3ad   : > { %v1447_v41 = vadd.f32 %v1764_v59, %v1446_v57 }
 0x3af   : > { %1488 = vst [vmem:[%s2355_s11 + $0x18] sm:$0xff] %v1447_v41 }
 0x3b4   : > { %v1449_v37 = vpop.f32.mrf.mxu1 }
 0x3b5   : > { %v1450_v63 = vadd.f32 %v1764_v59, %v1449_v37 }
 0x3b7   : > { %1489 = vst [vmem:[%s2355_s11 + $0x20] sm:$0xff] %v1450_v63 }
 0x3bc   : > { %v1452_v1 = vpop.f32.mrf.mxu1 }
 0x3bd   : > { %v1453_v44 = vadd.f32 %v1764_v59, %v1452_v1  ;;  %v1361_v4 = vpop.f32.mrf.mxu2 }
 0x3be   : > { %1665 = vmatmul.msk.f32.gmra.mxu3 %vm219_vm0, %v1361_v4 }
 0x3bf   : > { %1490 = vst [vmem:[%s2355_s11 + $0x28] sm:$0xff] %v1453_v44 }
 0x3ca   : > { %v1455_v42 = vpop.f32.mrf.mxu2 }
 0x3cb   : > { %v1456_v5 = vadd.f32 %v1764_v59, %v1455_v42 }
 0x3cd   : > { %1491 = vst [vmem:[%s2355_s11 + $0x30] sm:$0xff] %v1456_v5 }
 0x3d2   : > { %v1458_v8 = vpop.f32.mrf.mxu2 }
 0x3d3   : > { %v1459_v10 = vadd.f32 %v1764_v59, %v1458_v8 }
 0x3d5   : > { %1492 = vst [vmem:[%s2355_s11 + $0x38] sm:$0xff] %v1459_v10 }
 0x3de   : > { %v1461_v46 = vpop.f32.mrf.mxu2 }
 0x3df   : > { %v1462_v30 = vadd.f32 %v1764_v59, %v1461_v46 }
 0x3e1   : > { %1493 = vst [vmem:[%s2355_s11 + $0x40] sm:$0xff] %v1462_v30 }
 0x3e2   : > { %v1464_v11 = vpop.f32.mrf.mxu3 }
 0x3e3   : > { %v1465_v13 = vadd.f32 %v1764_v59, %v1464_v11 }
 0x3e5   : > { %1494 = vst [vmem:[%s2355_s11 + $0x48] sm:$0xff] %v1465_v13 }
 0x3ea   : > { %v1467_v53 = vpop.f32.mrf.mxu3 }
 0x3eb   : > { %v1468_v9 = vadd.f32 %v1764_v59, %v1467_v53 }
 0x3ed   : > { %1495 = vst [vmem:[%s2355_s11 + $0x50] sm:$0xff] %v1468_v9 }
 0x3fd   : > { %v1470_v49 = vpop.f32.mrf.mxu3 }
 0x3fe   : > { %v1471_v0 = vadd.f32 %v1764_v59, %v1470_v49 }
 0x400   : > { %1496 = vst [vmem:[%s2355_s11 + $0x58] sm:$0xff] %v1471_v0 }
 0x410   : > { %v1473_v16 = vpop.f32.mrf.mxu3 }
 0x411   : > { %v1474_v28 = vadd.f32 %v1764_v59, %v1473_v16 }
 0x413   : > { %1497 = vst [vmem:[%s2355_s11 + $0x60] sm:$0xff] %v1474_v28 }
 0x418   : > { %v1476_v17 = vpop.f32.mrf.mxu3 }
 0x419   : > { %v1477_v47 = vadd.f32 %v1764_v59, %v1476_v17 }
 0x41b   : > { %1498 = vst [vmem:[%s2355_s11 + $0x68] sm:$0xff] %v1477_v47 }
 0x420   : > { %v1479_v60 = vpop.f32.mrf.mxu3 }
 0x421   : > { %v1480_v21 = vadd.f32 %v1764_v59, %v1479_v60 }
 0x423   : > { %1499 = vst [vmem:[%s2355_s11 + $0x70] sm:$0xff] %v1480_v21 }
 0x441   : > { %v1482_v7 = vpop.f32.mrf.mxu3 }
 0x442   : > { %v1483_v14 = vadd.f32 %v1764_v59, %v1482_v7 }
 0x444   : > { %1500 = vst [vmem:[%s2355_s11 + $0x78] sm:$0xff] %v1483_v14 }
 0x445   : > { %1856 = shalt.err (!%p1853_p3)
}
 0x446   : > { %s1896_s7 = smov 128   ;;  %s1897_s9 = smov 8  }
 0x447   : > { %1680 = dma.vmem_to_hbm [thread:$0]  (%p1961_p5), %s1515_s22, 2048, %s1517_s23, %s1502_s27, %s1896_s7, %s1896_s7, %s1897_s9  }
 0x448 PF: > { %p1686_p4 = scmp.ge.s32.totalorder %s1891_s18, 2  ;;  %s1531_s10 = sand.u32 1, %s1879_s15  }
 0x449   : > { %s1532_s11 = scalar_lea.sflag [#allocation3], %s1531_s10 }
 0x44a   : > { %p1683_p7 = pnand %p1686_p4, %p1965_p6 }
 0x44c   : > { %p1684_p8 = pneg %p1683_p7 }
 0x44e   : > { %1874 = dma.done.wait (%p1684_p8), %s1532_s11, 2048  }
 0x44f   : > { %1876 = vsyncadd (%p1684_p8), %s1532_s11, 4294965248  ;;  %p14_p9 = scmp.ge.s32.totalorder %s1948_s21, 4   ;;  %s2416_s15 = smov %s1883_s16 }
 0x450   : > { %s2417_s16 = smov %s1887_s17  ;;  %s2418_s17 = smov %s1959_s24 }
 0x451   : > { %s2419_s18 = smov %s1948_s21  ;;  %16 = sbr.rel (!%p14_p9) target bundleno = 3 (0x3), region = 71 }
 0x456   :  { %1538 = vsyncpa [#allocation3], 1 }
 0x457   :  { %1540 = vsyncpa [#allocation3 + $0x1], 1 }

</bundles_post_ra>
